<compile_context>
chip_gen: v7x
topology: tpu7x:2x2x1
jax: 0.10.0
libtpu: 0.0.40
codegen_flags: <defaults>
</compile_context>

<pallas_src>
import jax
import jax.numpy as jnp
from jax.experimental import pallas as pl
from jax.experimental.pallas import tpu as pltpu

IN_FEATURES = 768
HIDDEN = 64


def _fc_relu_kernel(x_ref, w_ref, b_ref, o_ref):
    # x_ref: (tb, F)  w_ref: (F, H)  b_ref: (1, H)  o_ref: (tb, H)
    y = jnp.dot(x_ref[...], w_ref[...], preferred_element_type=jnp.float32)
    y = y + b_ref[...].astype(jnp.float32)          # bias broadcast over rows
    o_ref[...] = jnp.maximum(y, 0.0).astype(o_ref.dtype)
    # Dropout(p=0.5): identity in eval mode.


def _round_up(n, m):
    return ((n + m - 1) // m) * m


def simple_text_model(x, w, b, *, tile_b=1024):
    """Forward pass: relu(x @ w + b); dropout is identity (eval mode).

    x: (B, 768) float32 or bfloat16
    w: (768, H) float32   (transposed PyTorch nn.Linear weight)
    b: (H,)     float32
    """
    B, F = x.shape
    H = w.shape[1]
    assert F == IN_FEATURES and w.shape[0] == F and b.shape == (H,)

    x_itemsize = jnp.dtype(x.dtype).itemsize
    out_dtype = x.dtype
    out_itemsize = jnp.dtype(out_dtype).itemsize

    # Sublane granularity: 8 for f32, 16 for bf16 (packed sublanes).
    sub = 16 if x_itemsize == 2 else 8

    # Batch tile: big enough to amortize the ~0.35 us per-grid-step overhead,
    # but capped so the 'parallel' grid axis has >= 2 steps (v7x megacore).
    tb = min(tile_b, _round_up(pl.cdiv(B, 2), sub))
    tb = max(sub, (tb // sub) * sub)

    grid = (pl.cdiv(B, tb),)   # partial last block is masked by Pallas

    # Only the tiny weight/bias are cast; x is consumed as-is (no extra HBM
    # pass over the dominant x stream).
    w_in = w.astype(x.dtype)
    b2d = b.reshape(1, H).astype(jnp.float32)

    # Advisory cost hint for XLA's scheduler around this HBM-bound call.
    cost = pl.CostEstimate(
        flops=2 * B * F * H,
        transcendentals=0,
        bytes_accessed=(B * F * x_itemsize + F * H * x_itemsize
                        + H * 4 + B * H * out_itemsize),
    )

    # Double-buffered x + out tiles, plus resident weight/bias.
    vmem_est = 2 * tb * (F * x_itemsize + H * out_itemsize) + F * H * x_itemsize + 4 * H
    vmem_limit = None
    if vmem_est > 12 * 1024 * 1024:
        # Stay under v7x's 64 MiB physical per-TC while lifting v5e's 16 MiB default.
        vmem_limit = min(_round_up(2 * vmem_est, 1 << 20), 48 << 20)

    out = pl.pallas_call(
        _fc_relu_kernel,
        out_shape=jax.ShapeDtypeStruct((B, H), out_dtype),
        grid_spec=pl.GridSpec(
            grid=grid,
            in_specs=[
                pl.BlockSpec((tb, F), lambda i: (i, 0)),   # x tile (pipelined)
                pl.BlockSpec((F, H), lambda i: (0, 0)),    # full weight, resident
                pl.BlockSpec((1, H), lambda i: (0, 0)),    # bias, resident
            ],
            out_specs=pl.BlockSpec((tb, H), lambda i: (i, 0)),
        ),
        compiler_params=pltpu.CompilerParams(
            dimension_semantics=("parallel",),
            vmem_limit_bytes=vmem_limit,
        ),
        cost_estimate=cost,
    )(x, w_in, b2d)

    return out


if __name__ == "__main__":
    key = jax.random.PRNGKey(0)
    kx, kw, kb = jax.random.split(key, 3)

    # Small, non-divisible batch to exercise both the 2-step parallel grid and
    # the masked partial last block.
    B = 10
    x = jax.random.normal(kx, (B, IN_FEATURES), dtype=jnp.float32)
    # Deterministic parameter init (mimic torch.nn.Linear uniform bound).
    bound = 1.0 / (IN_FEATURES ** 0.5)
    w = jax.random.uniform(kw, (IN_FEATURES, HIDDEN), jnp.float32, -bound, bound)
    b = jax.random.uniform(kb, (HIDDEN,), jnp.float32, -bound, bound)

    out = simple_text_model(x, w, b)
    out = jax.block_until_ready(out)

    # Reference check in plain JAX (dropout is identity in eval mode).
    ref = jnp.maximum(x @ w + b, 0.0)
    assert out.shape == (B, HIDDEN)
    assert jnp.allclose(out, ref, atol=1e-4, rtol=1e-4)

    print("KERNEL_OK")
</pallas_src>

<mosaic_0001>
module attributes {stable_mosaic.version = 11 : i64} {
  func.func @_fc_relu_kernel(%arg0: i32, %arg1: memref<8x768xf32, #tpu.memory_space<vmem>>, %arg2: memref<768x64xf32, #tpu.memory_space<vmem>>, %arg3: memref<1x64xf32, #tpu.memory_space<vmem>>, %arg4: memref<8x64xf32, #tpu.memory_space<vmem>>) attributes {dimension_semantics = [#tpu.dimension_semantics<parallel>], iteration_bounds = array<i64: 2>, scalar_prefetch = 0 : i64, scratch_operands = 0 : i64, tpu.core_type = #tpu.core_type<tc>, window_params = [{transform_indices = @transform_0, window_bounds = array<i64: 8, 768>}, {pipeline_mode = #tpu.pipeline_mode<synchronous>, transform_indices = @transform_1, window_bounds = array<i64: 768, 64>}, {pipeline_mode = #tpu.pipeline_mode<synchronous>, transform_indices = @transform_2, window_bounds = array<i64: 1, 64>}, {transform_indices = @transform_3, window_bounds = array<i64: 8, 64>}]} {
    %c0 = arith.constant 0 : index
    %c0_0 = arith.constant 0 : index
    %0 = vector.load %arg1[%c0, %c0_0] : memref<8x768xf32, #tpu.memory_space<vmem>>, vector<8x768xf32>
    %c0_1 = arith.constant 0 : index
    %c0_2 = arith.constant 0 : index
    %1 = vector.load %arg2[%c0_1, %c0_2] : memref<768x64xf32, #tpu.memory_space<vmem>>, vector<768x64xf32>
    %cst = arith.constant dense<0.000000e+00> : vector<8x64xf32>
    %2 = tpu.matmul %0, %1, %cst {dimension_numbers = #tpu.dot_dimension_numbers<[1], [0], [0], [1], [0, 0, 1, 1], [], []>} : vector<8x768xf32>, vector<768x64xf32>, vector<8x64xf32> -> vector<8x64xf32>
    %c0_3 = arith.constant 0 : index
    %c0_4 = arith.constant 0 : index
    %3 = vector.load %arg3[%c0_3, %c0_4] : memref<1x64xf32, #tpu.memory_space<vmem>>, vector<1x64xf32>
    %4 = vector.broadcast %3 : vector<1x64xf32> to vector<8x64xf32>
    %5 = arith.addf %2, %4 : vector<8x64xf32>
    %cst_5 = arith.constant 0.000000e+00 : f32
    %6 = vector.broadcast %cst_5 : f32 to vector<8x64xf32>
    %7 = arith.maximumf %5, %6 : vector<8x64xf32>
    %c0_6 = arith.constant 0 : index
    %c0_7 = arith.constant 0 : index
    %8 = vector.load %arg4[%c0_6, %c0_7] : memref<8x64xf32, #tpu.memory_space<vmem>>, vector<8x64xf32>
    tpu.vector_store %arg4[%c0_6, %c0_7], %7 {strides = array<i32>} : memref<8x64xf32, #tpu.memory_space<vmem>>, vector<8x64xf32>,
    return
  }
  func.func @transform_0(%arg0: i32) -> (i32, i32) {
    %c0_i32 = arith.constant 0 : i32
    %c0_i32_0 = arith.constant 0 : i32
    return %arg0, %c0_i32 : i32, i32
  }
  func.func @transform_1(%arg0: i32) -> (i32, i32) {
    %c0_i32 = arith.constant 0 : i32
    %c0_i32_0 = arith.constant 0 : i32
    %c0_i32_1 = arith.constant 0 : i32
    return %c0_i32, %c0_i32_0 : i32, i32
  }
  func.func @transform_2(%arg0: i32) -> (i32, i32) {
    %c0_i32 = arith.constant 0 : i32
    %c0_i32_0 = arith.constant 0 : i32
    %c0_i32_1 = arith.constant 0 : i32
    return %c0_i32, %c0_i32_0 : i32, i32
  }
  func.func @transform_3(%arg0: i32) -> (i32, i32) {
    %c0_i32 = arith.constant 0 : i32
    %c0_i32_0 = arith.constant 0 : i32
    return %arg0, %c0_i32 : i32, i32
  }
}

</mosaic_0001>

<bundles_post_ra>
// kernel: tpu_custom_call.1
= control target key start
LH: loop header
LB: loop body
LE: loop exit
PB: predicated region body
PF: predicated region fallthrough
CT: control target
= control target key end

     0   :  { %8 = vsyncpa [#allocation3], 0  ;;  %s1305_s0 = inlined_call_operand.vmem [shape: f32[10,768], index: 0, kind: input, shape index: {}]   ;;  %s1306_s1 = inlined_call_operand.vmem [shape: f32[768,64], index: 1, kind: input, shape index: {}]   ;;  %s1307_s2 = inlined_call_operand.vmem [shape: f32[1,64], index: 2, kind: input, shape index: {}]   ;;  %s1308_s3 = inlined_call_operand.hbm [shape: f32[10,64], index: 3, kind: output, shape index: {}]  }
   0x1   :  { %10 = vsyncpa [#allocation3 + $0x1], 0  ;;  %s901_s12 = smov 0   ;;  %s903_s13 = smov 0  }
   0x2   :  { %s905_s14 = smov 0   ;;  %s907_s15 = smov 0  }
   0x3 LB: > { %s922_s16 = sadd.s32 4294967295, %s878_s15   ;;  %s564_s17 = sadd.s32 4294967294, %s878_s15   ;;  %s878_s15 = sphi %s907_s15, %s1314_s15   ;;  %s874_s14 = sphi %s905_s14, %s1313_s14   ;;  %s870_s13 = sphi %s903_s13, %s1312_s13   ;;  %s866_s12 = sphi %s901_s12, %s1311_s12  }
   0x4   : > { %s926_s18 = sadd.s32 1, %s878_s15   ;;  %s91_s19 = sadd.s32 1, %s874_s14 }
   0x5   : > { %s88_s20 = ssub.s32 %s878_s15, %s926_s18  ;;  %p101_p0 = scmp.ne.s32.totalorder %s874_s14, %s870_s13 }
   0x6   : > { %p89_p1 = scmp.eq.s32.totalorder %s88_s20, 0  ;;  %p102_p2 = scmp.eq.s32.totalorder %s922_s16, 1 }
   0x7   : > { %p107_p3 = scmp.ne.s32.totalorder %s870_s13, %s866_s12  ;;  %p108_p4 = scmp.eq.s32.totalorder %s564_s17, 1 }
   0x8   : > { %s937_s21 = scalar_select %p89_p1, %s874_s14, %s91_s19  }
   0x9   : > { %p939_p5 = por %p102_p2, %p101_p0  ;;  %p943_p6 = por %p108_p4, %p107_p3 }
   0xa   : > { %p567_p7 = scmp.ge.s32.totalorder %s878_s15, 1  ;;  %p140_p8 = scmp.lt.s32.totalorder %s878_s15, 3 }
   0xc   : > { %p141_p9 = pnand %p567_p7, %p140_p8 }
   0xd   : > { %v191_v0 = vld [vmem:[%s1306_s1 + $0x80] sm:$0xff] (!%p141_p9)  ;;  %v192_v1 = vld [vmem:[%s1306_s1 + $0x88] sm:$0xff] (!%p141_p9)  ;;  %v193_v11 = vld [vmem:[%s1306_s1 + $0x90] sm:$0xff] (!%p141_p9)  ;;  %p164_p10 = scmp.lt.s32.totalorder (!%p141_p9), %s922_s16, 1  ;;  %s161_s4 = sand.u32 (!%p141_p9), 1, %s870_s13   ;;  %vm489_vm0 = vcmask (!%p141_p9), 523264  }
   0xe   : > { %144 = sbr.rel (%p141_p9) target bundleno = 313 (0x139), region = 32  ;;  %v175_v2 = vld [vmem:[%s1306_s1] sm:$0xff] (!%p141_p9)  ;;  %v680_v3 = vpack.c.bf16 (!%p141_p9), %v192_v1, %v191_v0  ;;  %v176_v4 = vld [vmem:[%s1306_s1 + $0x8] sm:$0xff] (!%p141_p9)  ;;  %v194_v13 = vld [vmem:[%s1306_s1 + $0x98] sm:$0xff] (!%p141_p9)  ;;  %s568_s6 = sshll.u32 (!%p141_p9), %s161_s4, 3 }
   0xf   : > { %v223_v5 = vld [vmem:[%s1306_s1 + $0x180] sm:$0xff] (!%p141_p9)  ;;  %v224_v6 = vld [vmem:[%s1306_s1 + $0x188] sm:$0xff] (!%p141_p9)  ;;  %v682_v7 = vpack.c.bf16 (!%p141_p9), %v176_v4, %v175_v2  ;;  %v177_v14 = vld [vmem:[%s1306_s1 + $0x10] sm:$0xff] (!%p141_p9)  ;;  %v684_v16 = vpack.c.bf16 (!%p141_p9), %v194_v13, %v193_v11  ;;  %s163_s8 = scalar_lea.vmem (!%p141_p9), [#allocation2], %s568_s6  ;;  %s492_s19 = scalar_lea.sflag (!%p141_p9), [#allocation3], %s161_s4 }
  0x10   : > { %v712_v8 = vpack.c.bf16 (!%p141_p9), %v224_v6, %v223_v5  ;;  %v207_v9 = vld [vmem:[%s1306_s1 + $0x100] sm:$0xff] (!%p141_p9)  ;;  %v208_v10 = vld [vmem:[%s1306_s1 + $0x108] sm:$0xff] (!%p141_p9)  ;;  %681 = vmatprep.subr.bf16.mxu0 (!%p141_p9), %v680_v3  ;;  %v178_v15 = vld [vmem:[%s1306_s1 + $0x18] sm:$0xff] (!%p141_p9)  ;;  %s505_s9 = sshll.u32 (!%p141_p9), %s163_s8, 4  ;;  %s1265_s9 = int_to_ptr.vmem [resolvable:$true] %s505_s9 }
  0x11   : > { %v714_v12 = vpack.c.bf16 (!%p141_p9), %v208_v10, %v207_v9  ;;  %683 = vmatpush3.bf16.msra.mxu0 (!%p141_p9), %v682_v7  ;;  %v686_v17 = vpack.c.bf16 (!%p141_p9), %v178_v15, %v177_v14  ;;  %v225_v18 = vld [vmem:[%s1306_s1 + $0x190] sm:$0xff] (!%p141_p9)  ;;  %v226_v19 = vld [vmem:[%s1306_s1 + $0x198] sm:$0xff] (!%p141_p9)  ;;  %v195_v23 = vld [vmem:[%s1306_s1 + $0xa0] sm:$0xff] (!%p141_p9)  ;;  %s816_s20 = scalar_lea.vmem (!%p141_p9), %s1265_s9, 128 }
  0x12   : > { %713 = vmatprep.subr.bf16.mxu1 (!%p141_p9), %v712_v8  ;;  %v209_v20 = vld [vmem:[%s1306_s1 + $0x110] sm:$0xff] (!%p141_p9)  ;;  %v716_v21 = vpack.c.bf16 (!%p141_p9), %v226_v19, %v225_v18  ;;  %v210_v22 = vld [vmem:[%s1306_s1 + $0x118] sm:$0xff] (!%p141_p9)  ;;  %v196_v24 = vld [vmem:[%s1306_s1 + $0xa8] sm:$0xff] (!%p141_p9)  ;;  %685 = vmatprep.subr.bf16.mxu0 (!%p141_p9), %v684_v16  ;;  %p817_p11 = scmp.ne.s32.totalorder (!%p141_p9), %s1265_s9, %s816_s20 }
  0x13   : > { %715 = vmatpush3.bf16.msra.mxu1 (!%p141_p9), %v714_v12  ;;  %v718_v25 = vpack.c.bf16 (!%p141_p9), %v210_v22, %v209_v20  ;;  %v688_v26 = vpack.c.bf16 (!%p141_p9), %v196_v24, %v195_v23  ;;  %v179_v27 = vld [vmem:[%s1306_s1 + $0x20] sm:$0xff] (!%p141_p9)  ;;  %v180_v28 = vld [vmem:[%s1306_s1 + $0x28] sm:$0xff] (!%p141_p9)  ;;  %v197_v35 = vld [vmem:[%s1306_s1 + $0xb0] sm:$0xff] (!%p141_p9) }
  0x14   : > { %v227_v29 = vld [vmem:[%s1306_s1 + $0x1a0] sm:$0xff] (!%p141_p9)  ;;  %717 = vmatprep.subr.bf16.mxu1 (!%p141_p9), %v716_v21  ;;  %v228_v30 = vld [vmem:[%s1306_s1 + $0x1a8] sm:$0xff] (!%p141_p9)  ;;  %v690_v33 = vpack.c.bf16 (!%p141_p9), %v180_v28, %v179_v27  ;;  %v198_v36 = vld [vmem:[%s1306_s1 + $0xb8] sm:$0xff] (!%p141_p9)  ;;  %p818_p12 = pnand (!%p141_p9), %p817_p11, %p939_p5 }
  0x15   : > { %v211_v31 = vld [vmem:[%s1306_s1 + $0x120] sm:$0xff]  ;;  %v212_v32 = vld [vmem:[%s1306_s1 + $0x128] sm:$0xff]  ;;  %687 = vmatpush3.bf16.msra.mxu0 %v686_v17  ;;  %v720_v34 = vpack.c.bf16 %v228_v30, %v227_v29  ;;  %v181_v37 = vld [vmem:[%s1306_s1 + $0x30] sm:$0xff]  ;;  %v692_v39 = vpack.c.bf16 %v198_v36, %v197_v35  ;;  %s1043_s30 = scalar_select %p164_p10, %s922_s16, 1 }
  0x16   : > { %689 = vmatprep.subr.bf16.mxu0 %v688_v26  ;;  %v722_v38 = vpack.c.bf16 %v212_v32, %v211_v31  ;;  %v182_v40 = vld [vmem:[%s1306_s1 + $0x38] sm:$0xff]  ;;  %v229_v41 = vld [vmem:[%s1306_s1 + $0x1b0] sm:$0xff]  ;;  %v199_v46 = vld [vmem:[%s1306_s1 + $0xc0] sm:$0xff]  ;;  %p819_p13 = pneg %p818_p12 }
  0x17   : > { %719 = vmatpush3.bf16.msra.mxu1 %v718_v25  ;;  %v230_v42 = vld [vmem:[%s1306_s1 + $0x1b8] sm:$0xff]  ;;  %v213_v44 = vld [vmem:[%s1306_s1 + $0x130] sm:$0xff]  ;;  %v200_v47 = vld [vmem:[%s1306_s1 + $0xc8] sm:$0xff]  ;;  %v694_v48 = vpack.c.bf16 %v182_v40, %v181_v37  ;;  %s776_s5 = smul.u32 48, %s1043_s30 }
  0x18   : > { %721 = vmatprep.subr.bf16.mxu1 %v720_v34  ;;  %v724_v43 = vpack.c.bf16 %v230_v42, %v229_v41  ;;  %v214_v45 = vld [vmem:[%s1306_s1 + $0x138] sm:$0xff]  ;;  %v231_v49 = vld [vmem:[%s1306_s1 + $0x1c0] sm:$0xff]  ;;  %v232_v50 = vld [vmem:[%s1306_s1 + $0x1c8] sm:$0xff]  ;;  %v696_v52 = vpack.c.bf16 %v200_v47, %v199_v46 }
  0x19   : > { %691 = vmatpush3.bf16.msra.mxu0 %v690_v33  ;;  %v726_v51 = vpack.c.bf16 %v214_v45, %v213_v44  ;;  %v183_v53 = vld [vmem:[%s1306_s1 + $0x40] sm:$0xff]  ;;  %v184_v54 = vld [vmem:[%s1306_s1 + $0x48] sm:$0xff]  ;;  %v728_v56 = vpack.c.bf16 %v232_v50, %v231_v49  ;;  %v201_v58 = vld [vmem:[%s1306_s1 + $0xd0] sm:$0xff]  ;;  %s1100_s7 = scalar_lea.vmem %s1305_s0, %s776_s5 }
  0x1a   : > { %693 = vmatprep.subr.bf16.mxu0 %v692_v39  ;;  %v215_v55 = vld [vmem:[%s1306_s1 + $0x140] sm:$0xff]  ;;  %v216_v57 = vld [vmem:[%s1306_s1 + $0x148] sm:$0xff]  ;;  %v202_v59 = vld [vmem:[%s1306_s1 + $0xd8] sm:$0xff]  ;;  %v698_v62 = vpack.c.bf16 %v184_v54, %v183_v53 }
  0x1b   : > { %723 = vmatpush3.bf16.msra.mxu1 %v722_v38  ;;  %v233_v60 = vld [vmem:[%s1306_s1 + $0x1d0] sm:$0xff]  ;;  %v234_v61 = vld [vmem:[%s1306_s1 + $0x1d8] sm:$0xff]  ;;  %v730_v63 = vpack.c.bf16 %v216_v57, %v215_v55  ;;  %v700_v0 = vpack.c.bf16 %v202_v59, %v201_v58  ;;  %v203_v6 = vld [vmem:[%s1306_s1 + $0xe0] sm:$0xff] }
  0x1c   : > { %725 = vmatprep.subr.bf16.mxu1 %v724_v43  ;;  %v185_v1 = vld [vmem:[%s1306_s1 + $0x50] sm:$0xff]  ;;  %v186_v2 = vld [vmem:[%s1306_s1 + $0x58] sm:$0xff]  ;;  %v732_v4 = vpack.c.bf16 %v234_v61, %v233_v60  ;;  %v204_v7 = vld [vmem:[%s1306_s1 + $0xe8] sm:$0xff] }
  0x1d   : > { %695 = vmatpush3.bf16.msra.mxu0 %v694_v48  ;;  %v217_v3 = vld [vmem:[%s1306_s1 + $0x150] sm:$0xff]  ;;  %v218_v5 = vld [vmem:[%s1306_s1 + $0x158] sm:$0xff]  ;;  %v235_v8 = vld [vmem:[%s1306_s1 + $0x1e0] sm:$0xff]  ;;  %v702_v10 = vpack.c.bf16 %v186_v2, %v185_v1  ;;  %v704_v14 = vpack.c.bf16 %v204_v7, %v203_v6 }
  0x1e   : > { %697 = vmatprep.subr.bf16.mxu0 %v696_v52  ;;  %v236_v9 = vld [vmem:[%s1306_s1 + $0x1e8] sm:$0xff]  ;;  %v187_v11 = vld [vmem:[%s1306_s1 + $0x60] sm:$0xff]  ;;  %v734_v13 = vpack.c.bf16 %v218_v5, %v217_v3  ;;  %v205_v19 = vld [vmem:[%s1306_s1 + $0xf0] sm:$0xff] }
  0x1f   : > { %727 = vmatpush3.bf16.msra.mxu1 %v726_v51  ;;  %v170_v12 = vld [vmem:[%s1100_s7 + $0x8] sm:$0xff]  ;;  %v219_v16 = vld [vmem:[%s1306_s1 + $0x160] sm:$0xff]  ;;  %v736_v18 = vpack.c.bf16 %v236_v9, %v235_v8  ;;  %v206_v20 = vld [vmem:[%s1306_s1 + $0xf8] sm:$0xff] }
  0x20   : > { %729 = vmatprep.subr.bf16.mxu1 %v728_v56  ;;  %v188_v15 = vld [vmem:[%s1306_s1 + $0x68] sm:$0xff]  ;;  %342 = vmatprep.mubr.f32.mxu0 %v170_v12  ;;  %v172_v21 = vld [vmem:[%s1100_s7 + $0x18] sm:$0xff]  ;;  %v237_v22 = vld [vmem:[%s1306_s1 + $0x1f0] sm:$0xff]  ;;  %v708_v26 = vpack.c.bf16 %v206_v20, %v205_v19 }
  0x21   : > { %699 = vmatpush3.bf16.msra.mxu0 %v698_v62  ;;  %v220_v17 = vld [vmem:[%s1306_s1 + $0x168] sm:$0xff]  ;;  %v238_v23 = vld [vmem:[%s1306_s1 + $0x1f8] sm:$0xff]  ;;  %412 = vmatprep.mubr.f32.mxu1 %v172_v21  ;;  %v706_v24 = vpack.c.bf16 %v188_v15, %v187_v11  ;;  %v189_v27 = vld [vmem:[%s1306_s1 + $0x70] sm:$0xff] }
  0x22   : > { %701 = vmatprep.subr.bf16.mxu0 %v700_v0  ;;  %v738_v25 = vpack.c.bf16 %v220_v17, %v219_v16  ;;  %v190_v28 = vld [vmem:[%s1306_s1 + $0x78] sm:$0xff]  ;;  %v221_v29 = vld [vmem:[%s1306_s1 + $0x170] sm:$0xff]  ;;  %v740_v30 = vpack.c.bf16 %v238_v23, %v237_v22  ;;  %v255_v32 = vld [vmem:[%s1306_s1 + $0x280] sm:$0xff] }
  0x23   : > { %731 = vmatpush3.bf16.msra.mxu1 %v730_v63  ;;  %v222_v31 = vld [vmem:[%s1306_s1 + $0x178] sm:$0xff]  ;;  %v256_v33 = vld [vmem:[%s1306_s1 + $0x288] sm:$0xff]  ;;  %v710_v34 = vpack.c.bf16 %v190_v28, %v189_v27  ;;  %v239_v37 = vld [vmem:[%s1306_s1 + $0x200] sm:$0xff] }
  0x24   : > { %733 = vmatprep.subr.bf16.mxu1 %v732_v4  ;;  %v742_v35 = vpack.c.bf16 %v222_v31, %v221_v29  ;;  %v744_v36 = vpack.c.bf16 %v256_v33, %v255_v32  ;;  %v240_v38 = vld [vmem:[%s1306_s1 + $0x208] sm:$0xff]  ;;  %v257_v39 = vld [vmem:[%s1306_s1 + $0x290] sm:$0xff]  ;;  %v258_v40 = vld [vmem:[%s1306_s1 + $0x298] sm:$0xff] }
  0x25   : > { %703 = vmatpush3.bf16.msra.mxu0 %v702_v10  ;;  %v169_v41 = vld [vmem:[%s1100_s7] sm:$0xff]  ;;  %v746_v42 = vpack.c.bf16 %v240_v38, %v239_v37  ;;  %v171_v43 = vld [vmem:[%s1100_s7 + $0x10] sm:$0xff]  ;;  %v748_v44 = vpack.c.bf16 %v258_v40, %v257_v39  ;;  %v242_v46 = vld [vmem:[%s1306_s1 + $0x218] sm:$0xff] }
  0x26   : > { %705 = vmatprep.subr.bf16.mxu0 %v704_v14  ;;  %v241_v45 = vld [vmem:[%s1306_s1 + $0x210] sm:$0xff]  ;;  %v259_v47 = vld [vmem:[%s1306_s1 + $0x2a0] sm:$0xff]  ;;  %v260_v48 = vld [vmem:[%s1306_s1 + $0x2a8] sm:$0xff] }
  0x27   : > { %735 = vmatpush3.bf16.msra.mxu1 %v734_v13  ;;  %v174_v49 = vld [vmem:[%s1100_s7 + $0x28] sm:$0xff]  ;;  %v750_v50 = vpack.c.bf16 %v242_v46, %v241_v45  ;;  %v752_v51 = vpack.c.bf16 %v260_v48, %v259_v47  ;;  %v243_v52 = vld [vmem:[%s1306_s1 + $0x220] sm:$0xff]  ;;  %v261_v54 = vld [vmem:[%s1306_s1 + $0x2b0] sm:$0xff] }
  0x28   : > { %737 = vmatprep.subr.bf16.mxu1 %v736_v18  ;;  %v244_v53 = vld [vmem:[%s1306_s1 + $0x228] sm:$0xff]  ;;  %v262_v55 = vld [vmem:[%s1306_s1 + $0x2b8] sm:$0xff]  ;;  %v245_v58 = vld [vmem:[%s1306_s1 + $0x230] sm:$0xff] }
  0x29   : > { %707 = vmatpush3.bf16.msra.mxu0 %v706_v24  ;;  %v754_v56 = vpack.c.bf16 %v244_v53, %v243_v52  ;;  %v756_v57 = vpack.c.bf16 %v262_v55, %v261_v54  ;;  %v246_v59 = vld [vmem:[%s1306_s1 + $0x238] sm:$0xff]  ;;  %v263_v60 = vld [vmem:[%s1306_s1 + $0x2c0] sm:$0xff]  ;;  %v264_v61 = vld [vmem:[%s1306_s1 + $0x2c8] sm:$0xff] }
  0x2a   : > { %709 = vmatprep.subr.bf16.mxu0 %v708_v26  ;;  %v758_v62 = vpack.c.bf16 %v246_v59, %v245_v58  ;;  %v760_v63 = vpack.c.bf16 %v264_v61, %v263_v60  ;;  %v247_v0 = vld [vmem:[%s1306_s1 + $0x240] sm:$0xff]  ;;  %v248_v1 = vld [vmem:[%s1306_s1 + $0x248] sm:$0xff]  ;;  %v265_v2 = vld [vmem:[%s1306_s1 + $0x2d0] sm:$0xff] }
  0x2b   : > { %739 = vmatpush3.bf16.msra.mxu1 %v738_v25  ;;  %v266_v3 = vld [vmem:[%s1306_s1 + $0x2d8] sm:$0xff]  ;;  %v762_v4 = vpack.c.bf16 %v248_v1, %v247_v0  ;;  %v249_v6 = vld [vmem:[%s1306_s1 + $0x250] sm:$0xff]  ;;  %v267_v8 = vld [vmem:[%s1306_s1 + $0x2e0] sm:$0xff] }
  0x2c   : > { %741 = vmatprep.subr.bf16.mxu1 %v740_v30  ;;  %v764_v5 = vpack.c.bf16 %v266_v3, %v265_v2  ;;  %v250_v7 = vld [vmem:[%s1306_s1 + $0x258] sm:$0xff]  ;;  %v268_v9 = vld [vmem:[%s1306_s1 + $0x2e8] sm:$0xff]  ;;  %v251_v12 = vld [vmem:[%s1306_s1 + $0x260] sm:$0xff] }
  0x2d   : > { %711 = vmatpush3.bf16.msra.mxu0 %v710_v34  ;;  %v766_v10 = vpack.c.bf16 %v250_v7, %v249_v6  ;;  %v768_v11 = vpack.c.bf16 %v268_v9, %v267_v8  ;;  %v252_v13 = vld [vmem:[%s1306_s1 + $0x268] sm:$0xff]  ;;  %v269_v14 = vld [vmem:[%s1306_s1 + $0x2f0] sm:$0xff]  ;;  %v270_v15 = vld [vmem:[%s1306_s1 + $0x2f8] sm:$0xff] }
  0x2e   : > { %745 = vmatprep.subr.bf16.mxu0 %v744_v36  ;;  %v770_v16 = vpack.c.bf16 %v252_v13, %v251_v12  ;;  %v772_v17 = vpack.c.bf16 %v270_v15, %v269_v14  ;;  %v253_v18 = vld [vmem:[%s1306_s1 + $0x270] sm:$0xff]  ;;  %v254_v19 = vld [vmem:[%s1306_s1 + $0x278] sm:$0xff]  ;;  %v173_v21 = vld [vmem:[%s1100_s7 + $0x20] sm:$0xff]  ;;  %s572_s7 = sshll.u32 %s922_s16, 7  ;;  %s880_s16 = smov [#allocation2]  }
  0x2f   : > { %743 = vmatpush3.bf16.msra.mxu1 %v742_v35  ;;  %v774_v20 = vpack.c.bf16 %v254_v19, %v253_v18  ;;  %v570_v23 = vld [vmem:[%s1307_s2] ss:$0 sm:$0xff]  ;;  %s1263_s17 = scalar_lea.hbm %s1308_s3, %s572_s7  ;;  %s820_s30 = sshll.u32 %s880_s16, 4  ;;  %s821_s30 = int_to_ptr.vmem [resolvable:$false] %s820_s30 }
  0x30   : > { %343 = vmatmul.mubr.f32.vlgmr.msra.gmra.mrb[0].mxu0 %v169_v41  ;;  %s822_s5 = scalar_lea.vmem %s821_s30, 256  ;;  %p823_p0 = scmp.lt.s32.totalorder %s1265_s9, %s821_s30 }
  0x31   : > { %747 = vmatpush3.bf16.msra.mxu0 %v746_v42  ;;  %482 = vmatprep.mubr.f32.mxu0 %v174_v49  ;;  %p824_p1 = scmp.lt.s32.totalorder %s822_s5, %s816_s20 }
  0x32   : > { %413 = vmatmul.mubr.f32.vlgmr.msra.gmra.mrb[0].mxu1 %v171_v43  ;;  %749 = vmatprep.subr.bf16.mxu0 %v748_v44 }
  0x33   : > { %p825_p2 = por %p824_p1, %p823_p0 }
  0x35   : > { %751 = vmatpush3.bf16.msra.mxu0 %v750_v50  ;;  %p826_p3 = pnand %p825_p2, %p819_p13 }
  0x36   : > { %753 = vmatprep.subr.bf16.mxu0 %v752_v51 }
  0x39   : > { %755 = vmatpush3.bf16.msra.mxu0 %v754_v56 }
  0x3a   : > { %757 = vmatprep.subr.bf16.mxu0 %v756_v57 }
  0x3d   : > { %759 = vmatpush3.bf16.msra.mxu0 %v758_v62 }
  0x3e   : > { %761 = vmatprep.subr.bf16.mxu0 %v760_v63 }
  0x41   : > { %763 = vmatpush3.bf16.msra.mxu0 %v762_v4 }
  0x42   : > { %765 = vmatprep.subr.bf16.mxu0 %v764_v5 }
  0x45   : > { %767 = vmatpush3.bf16.msra.mxu0 %v766_v10 }
  0x46   : > { %769 = vmatprep.subr.bf16.mxu0 %v768_v11 }
  0x49   : > { %771 = vmatpush3.bf16.msra.mxu0 %v770_v16 }
  0x4a   : > { %773 = vmatprep.subr.bf16.mxu0 %v772_v17 }
  0x4d   : > { %775 = vmatpush3.bf16.msra.mxu0 %v774_v20 }
  0x50   : > { %483 = vmatmul.mubr.f32.vlgmr.msra.gmra.mrb[2].mxu0 %v173_v21 }
 0x103   : > { %v607_v22 = vpop.f32.mrb[0].mxu0 }
 0x104   : > { %v608_v24 = vpop.f32.mrb[1].mxu0 }
 0x105   : > { %v642_v25 = vpop.f32.mrb[0].mxu1  ;;  %v609_v26 = vadd.f32 %v608_v24, %v607_v22 }
 0x106   : > { %v643_v27 = vpop.f32.mrb[1].mxu1 }
 0x107   : > { %v644_v28 = vadd.f32 %v643_v27, %v642_v25  ;;  %v345_v29 = vadd.f32 %v609_v26, %v570_v23 }
 0x109   : > { %v415_v30 = vadd.f32 %v644_v28, %v345_v29 }
 0x123   : > { %v677_v31 = vpop.f32.mrb[2].mxu0 }
 0x124   : > { %v678_v32 = vpop.f32.mrb[3].mxu0 }
 0x125   : > { %v679_v33 = vadd.f32 %v678_v32, %v677_v31 }
 0x127   : > { %v485_v34 = vadd.f32 %v679_v33, %v415_v30 }
 0x129   : > { %v488_v35 = vmax.f32 %v485_v34, 0.0 }
 0x12b   : > { %490 = vst.msk [vmem:[%s163_s8] sm:$0xff] %vm489_vm0, %v488_v35 }
 0x12c   : > { %829 = shalt.err (!%p826_p3)
}
 0x12d   : > { %s830_s24 = scalar_lea.hbm %s1263_s17, 128  ;;  %s834_s27 = scalar_lea.hbm %s1308_s3, 256 }
 0x12e   : > { %p831_p4 = scmp.ne.s32.totalorder %s1263_s17, %s830_s24  ;;  %p835_p9 = scmp.lt.u32.totalorder %s1263_s17, %s1308_s3 }
 0x12f   : > { %p836_p10 = scmp.lt.u32.totalorder %s834_s27, %s830_s24  ;;  %p838_p12 = scmp.lt.u32.totalorder %s830_s24, %s1263_s17 }
 0x130   : > { %p832_p7 = pnand %p831_p4, %p939_p5 }
 0x131   : > { %p837_p11 = por %p836_p10, %p835_p9 }
 0x132   : > { %p833_p8 = pneg %p832_p7 }
 0x133   : > { %p839_p13 = por %p838_p12, %p837_p11 }
 0x135   : > { %p840_p0 = pnand %p839_p13, %p833_p8 }
 0x137   : > { %843 = shalt.err (!%p840_p0)
}
 0x138   : > { %777 = dma.vmem_to_hbm [thread:$0]  (%p939_p5), %s1265_s9, 128, %s1263_s17, %s492_s19  }
 0x139 PF: > { %p783_p1 = scmp.ge.s32.totalorder %s878_s15, 2  ;;  %s517_s4 = sand.u32 1, %s866_s12  }
 0x13a   : > { %s518_s6 = scalar_lea.sflag [#allocation3], %s517_s4 }
 0x13b   : > { %p780_p2 = pnand %p783_p1, %p943_p6 }
 0x13d   : > { %861 = dma.done.wait (!%p780_p2), %s518_s6, 128  }
 0x13e   : > { %863 = vsyncadd (!%p780_p2), %s518_s6, 4294967168  ;;  %p13_p3 = scmp.ge.s32.totalorder %s926_s18, 4   ;;  %s1311_s12 = smov %s870_s13 }
 0x13f   : > { %s1312_s13 = smov %s874_s14  ;;  %s1313_s14 = smov %s937_s21 }
 0x140   : > { %s1314_s15 = smov %s926_s18  ;;  %15 = sbr.rel (!%p13_p3) target bundleno = 3 (0x3), region = 67 }
 0x147   :  { %523 = vsyncpa [#allocation3], 1 }
 0x148   :  { %525 = vsyncpa [#allocation3 + $0x1], 1 }

</bundles_post_ra>
